<compile_context>
chip_gen: v6e
topology: v6e:2x2x1
jax: 0.10.0
libtpu: 0.0.40
codegen_flags: <defaults>
</compile_context>

<pallas_src>
import functools

import jax
import jax.numpy as jnp
from jax.experimental import pallas as pl
from jax.experimental.pallas import tpu as pltpu

# Sublane granule per element size (f32 -> 8, bf16 -> 16, int8/fp8 -> 32).
_DTYPE_SUBLANE = {4: 8, 2: 16, 1: 32}
_MIN_GRID_STEPS = 4                 # >= 2 grid steps per TensorCore on v7x
_FIXED_HEADROOM = 8 * 1024 * 1024   # slack for compiler-internal scratch


def _cdiv(a, b):
    return -(-a // b)


def _round_up(x, m):
    return _cdiv(x, m) * m


def _vmem_capacity_bytes():
    """Physical VMEM per TensorCore; conservative fallback if the query fails."""
    try:
        cap = getattr(pltpu.get_tpu_info(), "vmem_capacity_bytes", None)
        if cap:
            return int(cap)
    except Exception:
        pass
    return 64 * 1024 * 1024  # v7x per-TC size (smallest across v5e/v6e/v7x)


def _layernorm_kernel(alpha_ref, bias_ref, x_ref, o_ref, *, eps, d):
    # x_ref: (tile_rows, D) tile in VMEM; alpha/bias: (1,) f32 scalars in SMEM.
    x = x_ref[...].astype(jnp.float32)
    mean = jnp.mean(x, axis=-1, keepdims=True)
    xc = x - mean
    # torch.std default is UNBIASED (ddof=1): divide by (d - 1); eps is added
    # to std (NOT to var).  This matches the reference module exactly and
    # intentionally differs from nn.LayerNorm (d == 1 -> inf, same as torch).
    var = jnp.sum(xc * xc, axis=-1, keepdims=True) / jnp.float32(d - 1)
    # Full-precision per-row reciprocal: only tile_rows values per step, so
    # its cost is negligible; keeps rounding closest to the torch divide.
    inv = pl.reciprocal(jnp.sqrt(var) + jnp.float32(eps), approx=False)
    scale = alpha_ref[0] * inv                 # (tile_rows, 1)
    shift = bias_ref[0] - mean * scale         # fold mean into the affine
    # Store path reads x directly; xc's live range ends at the reductions.
    o_ref[...] = (x * scale + shift).astype(o_ref.dtype)


def _pick_tile_rows(rows, d, itemsize, granule, vmem_limit):
    # Budget on the f32 working set: 2x double-buffered in + out pipeline
    # buffers (input dtype) plus ~3 full-tile f32 temporaries in the kernel.
    per_row_bytes = 4 * d * itemsize + 3 * d * 4
    budget = max(0, vmem_limit - _FIXED_HEADROOM)
    by_vmem = max(granule, (budget // max(1, per_row_bytes)) // granule * granule)
    # Keep >= _MIN_GRID_STEPS grid steps when rows allow, so the "parallel"
    # row axis gives each v7x TensorCore >= 2 steps of prefetch/compute overlap.
    cap = max(granule, _round_up(_cdiv(rows, _MIN_GRID_STEPS), granule))
    tile_rows = max(granule, min(by_vmem, cap))
    if tile_rows >= rows:
        return rows  # single block equal to the full array: always legal
    if rows % tile_rows != 0:
        # Prefer an exact divisor (no ragged last block) within a 2x shrink;
        # otherwise keep the cdiv grid and let Pallas mask the partial block
        # (no wrapper pad / slice HBM round trips either way).
        t = tile_rows
        while t >= max(granule, tile_rows // 2):
            if rows % t == 0:
                return t
            t -= granule
    return tile_rows


def layer_normalization(x, alpha, bias, eps=1e-6, tile_rows=None):
    """x: (..., D); alpha, bias: shape-(1,) scalar parameters (torch semantics)."""
    orig_shape = x.shape
    d = orig_shape[-1]
    x2 = x.reshape(-1, d)
    rows = x2.shape[0]
    itemsize = jnp.dtype(x2.dtype).itemsize
    granule = _DTYPE_SUBLANE.get(itemsize, 8)

    vmem_cap = _vmem_capacity_bytes()
    vmem_limit = (vmem_cap * 3) // 4  # 48 MiB on v7x, 96 MiB on v5e/v6e

    if tile_rows is None:
        tile_rows = _pick_tile_rows(rows, d, itemsize, granule, vmem_limit)
    else:
        tile_rows = min(rows, max(granule, _round_up(tile_rows, granule)))

    grid_rows = _cdiv(rows, tile_rows)

    # TODO(synk): for D < 128, repack rows into lanes (segmented per-row
    # reduce over a (rows*D/128, 128) view) so output stores are lane-dense;
    # skipped here because typical hidden sizes are multiples of 128.

    kernel = functools.partial(_layernorm_kernel, eps=eps, d=d)

    out = pl.pallas_call(
        kernel,
        out_shape=jax.ShapeDtypeStruct((rows, d), x.dtype),
        grid=(grid_rows,),
        in_specs=[
            pl.BlockSpec(memory_space=pltpu.MemorySpace.SMEM),   # alpha
            pl.BlockSpec(memory_space=pltpu.MemorySpace.SMEM),   # bias
            pl.BlockSpec((tile_rows, d), lambda i: (i, 0)),      # x tile
        ],
        out_specs=pl.BlockSpec((tile_rows, d), lambda i: (i, 0)),
        compiler_params=pltpu.CompilerParams(
            dimension_semantics=("parallel",),
            vmem_limit_bytes=vmem_limit,
        ),
    )(alpha.astype(jnp.float32), bias.astype(jnp.float32), x2)

    return out.reshape(orig_shape)


if __name__ == "__main__":
    # Deterministic parameters (as in nn.Module __init__): alpha=1, bias=0.
    alpha = jnp.ones((1,), dtype=jnp.float32)
    bias = jnp.zeros((1,), dtype=jnp.float32)
    eps = 1e-6

    # Small transformer-like input: (batch=2, seq=8, hidden=32)
    key = jax.random.PRNGKey(0)
    x = jax.random.normal(key, (2, 8, 32), dtype=jnp.float32)

    out = layer_normalization(x, alpha, bias, eps=eps)
    out = jax.block_until_ready(out)

    # Reference check (plain JAX, unbiased std to match torch.std default).
    mean = jnp.mean(x, axis=-1, keepdims=True)
    std = jnp.sqrt(jnp.sum((x - mean) ** 2, axis=-1, keepdims=True) / (x.shape[-1] - 1))
    ref = alpha[0] * (x - mean) / (std + eps) + bias[0]
    assert jnp.allclose(out, ref, atol=1e-5, rtol=1e-5)

    print("KERNEL_OK")
</pallas_src>

<mosaic_0001>
module attributes {stable_mosaic.version = 11 : i64} {
  func.func @_layernorm_kernel(%arg0: i32, %arg1: memref<1xf32, #tpu.memory_space<smem>>, %arg2: memref<1xf32, #tpu.memory_space<smem>>, %arg3: memref<8x32xf32, #tpu.memory_space<vmem>>, %arg4: memref<8x32xf32, #tpu.memory_space<vmem>>) attributes {dimension_semantics = [#tpu.dimension_semantics<parallel>], iteration_bounds = array<i64: 2>, scalar_prefetch = 0 : i64, scratch_operands = 0 : i64, tpu.core_type = #tpu.core_type<tc>, window_params = [{transform_indices = @transform_0, window_bounds = array<i64: 1>}, {transform_indices = @transform_1, window_bounds = array<i64: 1>}, {transform_indices = @transform_2, window_bounds = array<i64: 8, 32>}, {transform_indices = @transform_3, window_bounds = array<i64: 8, 32>}]} {
    %c0 = arith.constant 0 : index
    %c0_0 = arith.constant 0 : index
    %0 = vector.load %arg3[%c0, %c0_0] : memref<8x32xf32, #tpu.memory_space<vmem>>, vector<8x32xf32>
    %cst = arith.constant dense<0.000000e+00> : vector<8xf32>
    %1 = vector.multi_reduction <add>, %0, %cst [1] : vector<8x32xf32> to vector<8xf32>
    %2 = vector.shape_cast %1 : vector<8xf32> to vector<8x1xf32>
    %cst_1 = arith.constant 3.200000e+01 : f32
    %3 = vector.broadcast %cst_1 : f32 to vector<8x1xf32>
    %4 = arith.divf %2, %3 : vector<8x1xf32>
    %5 = vector.broadcast %4 : vector<8x1xf32> to vector<8x32xf32>
    %6 = arith.subf %0, %5 : vector<8x32xf32>
    %7 = arith.mulf %6, %6 : vector<8x32xf32>
    %cst_2 = arith.constant dense<0.000000e+00> : vector<8xf32>
    %8 = vector.multi_reduction <add>, %7, %cst_2 [1] : vector<8x32xf32> to vector<8xf32>
    %9 = vector.shape_cast %8 : vector<8xf32> to vector<8x1xf32>
    %cst_3 = arith.constant 3.100000e+01 : f32
    %10 = vector.broadcast %cst_3 : f32 to vector<8x1xf32>
    %11 = arith.divf %9, %10 : vector<8x1xf32>
    %12 = math.sqrt %11 : vector<8x1xf32>
    %cst_4 = arith.constant 9.99999997E-7 : f32
    %13 = vector.broadcast %cst_4 : f32 to vector<8x1xf32>
    %14 = arith.addf %12, %13 : vector<8x1xf32>
    %15 = tpu.reciprocal %14 : vector<8x1xf32> -> vector<8x1xf32>
    %c0_5 = arith.constant 0 : index
    %16 = memref.load %arg1[%c0_5] : memref<1xf32, #tpu.memory_space<smem>>
    %17 = vector.broadcast %16 : f32 to vector<8x1xf32>
    %18 = arith.mulf %17, %15 : vector<8x1xf32>
    %c0_6 = arith.constant 0 : index
    %19 = memref.load %arg2[%c0_6] : memref<1xf32, #tpu.memory_space<smem>>
    %20 = arith.mulf %4, %18 : vector<8x1xf32>
    %21 = vector.broadcast %19 : f32 to vector<8x1xf32>
    %22 = arith.subf %21, %20 : vector<8x1xf32>
    %23 = vector.broadcast %18 : vector<8x1xf32> to vector<8x32xf32>
    %24 = arith.mulf %0, %23 : vector<8x32xf32>
    %25 = vector.broadcast %22 : vector<8x1xf32> to vector<8x32xf32>
    %26 = arith.addf %24, %25 : vector<8x32xf32>
    %c0_7 = arith.constant 0 : index
    %c0_8 = arith.constant 0 : index
    %27 = vector.load %arg4[%c0_7, %c0_8] : memref<8x32xf32, #tpu.memory_space<vmem>>, vector<8x32xf32>
    tpu.vector_store %arg4[%c0_7, %c0_8], %26 {strides = array<i32>} : memref<8x32xf32, #tpu.memory_space<vmem>>, vector<8x32xf32>,
    return
  }
  func.func @transform_0(%arg0: i32) -> i32 {
    %c0_i32 = arith.constant 0 : i32
    %c0_i32_0 = arith.constant 0 : i32
    return %c0_i32 : i32
  }
  func.func @transform_1(%arg0: i32) -> i32 {
    %c0_i32 = arith.constant 0 : i32
    %c0_i32_0 = arith.constant 0 : i32
    return %c0_i32 : i32
  }
  func.func @transform_2(%arg0: i32) -> (i32, i32) {
    %c0_i32 = arith.constant 0 : i32
    %c0_i32_0 = arith.constant 0 : i32
    return %arg0, %c0_i32 : i32, i32
  }
  func.func @transform_3(%arg0: i32) -> (i32, i32) {
    %c0_i32 = arith.constant 0 : i32
    %c0_i32_0 = arith.constant 0 : i32
    return %arg0, %c0_i32 : i32, i32
  }
}

</mosaic_0001>

<bundles_post_ra>
// kernel: tpu_custom_call.1
= control target key start
LH: loop header
LB: loop body
LE: loop exit
PB: predicated region body
PF: predicated region fallthrough
CT: control target
= control target key end

     0   :  { %s637_s0 = inlined_call_operand.<no memory space> [shape: f32[1], index: 0, kind: input, shape index: {}]   ;;  %s638_s1 = inlined_call_operand.<no memory space> [shape: f32[1], index: 1, kind: input, shape index: {}]   ;;  %s639_s2 = inlined_call_operand.hbm [shape: f32[16,32], index: 2, kind: input, shape index: {}]   ;;  %s640_s3 = inlined_call_operand.hbm [shape: f32[16,32], index: 3, kind: output, shape index: {}]  }
   0x1   :  { %8 = sst [smem:[#allocation2]] %s637_s0 }
   0x2   :  { %9 = sst [smem:[#allocation3]] %s638_s1 }
   0x3   :  { %10 = vsyncpa [#allocation5], 0 }
   0x4   :  { %12 = vsyncpa [#allocation5 + $0x1], 0 }
   0x5   :  { %13 = vsyncpa [#allocation6], 0 }
   0x6   :  { %15 = vsyncpa [#allocation6 + $0x1], 0  ;;  %s489_s16 = smov 0   ;;  %s491_s17 = smov 0  }
   0x7   :  { %s493_s18 = smov 0   ;;  %s495_s19 = smov 0  }
   0x8 LB: > { %s510_s0 = sadd.s32 4294967295, %s459_s19   ;;  %s305_s1 = sadd.s32 4294967294, %s459_s19   ;;  %s459_s19 = sphi %s495_s19, %s657_s19   ;;  %s455_s18 = sphi %s493_s18, %s656_s18   ;;  %s451_s17 = sphi %s491_s17, %s655_s17   ;;  %s447_s16 = sphi %s489_s16, %s654_s16  }
   0x9   : > { %s514_s20 = sadd.s32 1, %s459_s19   ;;  %s70_s21 = sadd.s32 1, %s455_s18 }
   0xa   : > { %s67_s22 = ssub.s32 %s459_s19, %s514_s20  ;;  %p77_p0 = scmp.ne.s32.totalorder %s455_s18, %s451_s17 }
   0xb   : > { %p68_p1 = scmp.eq.s32.totalorder %s67_s22, 0  ;;  %p78_p2 = scmp.eq.s32.totalorder %s459_s19, 0 }
   0xc   : > { %p83_p3 = scmp.ne.s32.totalorder %s451_s17, %s447_s16  ;;  %p84_p4 = scmp.eq.s32.totalorder %s510_s0, 0 }
   0xd   : > { %s526_s23 = scalar_select %p68_p1, %s455_s18, %s70_s21  }
   0xe   : > { %p528_p5 = por %p78_p2, %p77_p0  ;;  %p532_p6 = por %p84_p4, %p83_p3 }
   0xf   : > { %p107_p7 = scmp.eq.s32.totalorder %s510_s0, 1  ;;  %p113_p8 = scmp.eq.s32.totalorder %s305_s1, 1 }
  0x10   : > { %s644_s25 = scalar_select %p532_p6, 1, 0 }
  0x11   : > { %p329_p10 = scmp.lt.s32.totalorder %s459_s19, 2  ;;  %p539_p11 = por %p107_p7, %p77_p0 }
  0x12   : > { %p543_p12 = por %p113_p8, %p83_p3  ;;  %s139_s28 = sand.u32 1, %s455_s18  }
  0x13   : > { %s645_s26 = scalar_select %p539_p11, 1, 0 }
  0x14   : > { %s646_s27 = scalar_select %p543_p12, 1, 0 }
  0x15   : > { %s309_s29 = sshll.u32 %s459_s19, 7  ;;  %s308_s30 = sshll.u32 %s139_s28, 3 }
  0x16   : > { %s552_s6 = scalar_lea.hbm %s639_s2, %s309_s29  ;;  %s143_s7 = scalar_lea.vmem [#allocation4], %s308_s30 }
  0x17   : > { %s150_s8 = sshll.u32 %s143_s7, 4  ;;  %p556_p13 = pnand %p329_p10, %p528_p5  ;;  %s560_s8 = int_to_ptr.vmem [resolvable:$true] %s150_s8 }
  0x18   : > { %s140_s10 = scalar_lea.sflag [#allocation5], %s139_s28  ;;  %s367_s11 = scalar_lea.hbm %s552_s6, 128 }
  0x19   : > { %p368_p2 = scmp.ne.s32.totalorder %s552_s6, %s367_s11  ;;  %p369_p3 = pneg %p556_p13 }
  0x1a   : > { %s372_s14 = scalar_lea.hbm %s639_s2, 256  ;;  %p373_p5 = scmp.lt.s32.totalorder %s552_s6, %s639_s2 }
  0x1b   : > { %p370_p4 = pnand %p369_p3, %p368_p2  ;;  %p374_p8 = scmp.lt.s32.totalorder %s372_s14, %s367_s11 }
  0x1d   : > { %p371_p7 = pneg %p370_p4  ;;  %p375_p10 = por %p374_p8, %p373_p5 }
  0x1f   : > { %p376_p9 = pnand %p375_p10, %p371_p7 }
  0x21   : > { %379 = shalt.err (!%p376_p9)
}
  0x22   : > { %s380_s21 = scalar_lea.vmem %s560_s8, 128  ;;  %s461_s22 = smov [#allocation4]  }
  0x23   : > { %p381_p0 = scmp.ne.s32.totalorder %s560_s8, %s380_s21  ;;  %s385_s24 = sshll.u32 %s461_s22, 4  ;;  %s386_s24 = int_to_ptr.vmem [resolvable:$false] %s385_s24 }
  0x24   : > { %s387_s28 = scalar_lea.vmem %s386_s24, 256  ;;  %p388_p4 = scmp.lt.s32.totalorder %s560_s8, %s386_s24 }
  0x25   : > { %p383_p1 = pnand %p381_p0, %p369_p3  ;;  %p389_p12 = scmp.lt.s32.totalorder %s387_s28, %s380_s21 }
  0x27   : > { %p384_p2 = pneg %p383_p1  ;;  %p390_p11 = por %p389_p12, %p388_p4 }
  0x29   : > { %p391_p6 = pnand %p390_p11, %p384_p2 }
  0x2b   : > { %394 = shalt.err (!%p391_p6)
}
  0x2c   : > { %324 = dma.hbm_to_vmem [thread:$0]  (!%p556_p13), %s552_s6, 128, %s560_s8, %s140_s10  }
  0x2d   : > { %p648_p9 = scmp.lt.s32.totalorder %s459_s19, 3  ;;  %p649_p7 = scmp.ge.s32.totalorder %s459_s19, 1 }
  0x2f   : > { %p156_p0 = pnand %p649_p7, %p648_p9 }
  0x30   : > { %s587_s29 = sand.u32 (!%p156_p0), 1, %s451_s17   ;;  %p650_p6 = scmp.ne.s32.totalorder (!%p156_p0), %s644_s25, 0 }
  0x31   : > { %159 = sbr.rel (%p156_p0) target bundleno = 397 (0x18d), region = 32  ;;  %s311_s30 = sshll.u32 (!%p156_p0), %s587_s29, 3 }
  0x32   : > { %s162_s4 = scalar_lea.sflag (!%p156_p0), [#allocation5], %s587_s29  ;;  %s165_s5 = scalar_lea.vmem (!%p156_p0), [#allocation4], %s311_s30 }
  0x36   : > { %438 = dma.done.wait (%p650_p6), %s162_s4, 128  }
  0x37   : > { %440 = vsyncadd (%p650_p6), %s162_s4, 4294967168  ;;  %vm189_vm0 = vcmask 261120   ;;  %v188_v0 = vld [vmem:[%s165_s5] sm:$0xff]  ;;  %s211_s25 = sld [smem:[#allocation2]]  ;;  %s314_s7 = sshll.u32 %s510_s0, 7 }
  0x38   : > { %v190_v1 = vsel %vm189_vm0, %v188_v0, 0.0  ;;  %s214_s6 = sld [smem:[#allocation3]]  ;;  %s187_s8 = scalar_lea.vmem [#allocation7], %s311_s30 }
  0x39   : > { %191 = vadd.xlane.f32.xlu0 %v190_v1  ;;  %s235_s9 = sshll.u32 %s187_s8, 4  ;;  %s233_s12 = scalar_lea.hbm %s640_s3, %s314_s7  ;;  %s236_s9 = int_to_ptr.vmem [resolvable:$true] %s235_s9 }
  0x3a   : > { %s222_s13 = scalar_lea.sflag [#allocation6], %s587_s29  ;;  %s395_s14 = scalar_lea.vmem %s236_s9, 128 }
  0x3b   : > { %p396_p11 = scmp.ne.s32.totalorder %s236_s9, %s395_s14  ;;  %p651_p12 = scmp.ne.s32.totalorder %s645_s26, 0 }
  0x3c   : > { %s462_s0 = smov [#allocation7]  }
  0x3d   : > { %v212_v15 = vstv %s211_s25  ;;  %p397_p13 = pnand %p396_p11, %p651_p12  ;;  %s399_s15 = sshll.u32 %s462_s0, 4  ;;  %s400_s15 = int_to_ptr.vmem [resolvable:$false] %s399_s15 }
  0x3e   : > { %v216_v18 = vstv %s214_s6  ;;  %s401_s1 = scalar_lea.vmem %s400_s15, 256  ;;  %p402_p3 = scmp.lt.s32.totalorder %s236_s9, %s400_s15 }
  0x3f   : > { %p398_p1 = pneg %p397_p13  ;;  %p403_p5 = scmp.lt.s32.totalorder %s401_s1, %s395_s14 }
  0x41   : > { %p404_p8 = por %p403_p5, %p402_p3 }
  0x43   : > { %p405_p10 = pnand %p404_p8, %p398_p1 }
  0xc2   : > { %v192_v2 = vpop.xlane.xlu0 %191 }
  0xc3   : > { %v194_v3 = vmul.f32 0.03125, %v192_v2 }
  0xc5   : > { %v195_v4 = vsub.f32 %v188_v0, %v194_v3 }
  0xc7   : > { %v196_v5 = vmul.f32 %v195_v4, %v195_v4 }
  0xc9   : > { %v197_v6 = vsel %vm189_vm0, %v196_v5, 0.0 }
  0xca   : > { %198 = vadd.xlane.f32.xlu0 %v197_v6 }
 0x153   : > { %v199_v7 = vpop.xlane.xlu0 %198 }
 0x154   : > { %v201_v8 = vmul.f32 0.032258064, %v199_v7 }
 0x156   : > { %363 = vrsqrt.f32 %v201_v8  ;;  %vm204_vm1 = vcmp.eq.f32.partialorder %v201_v8, inf  ;;  %v207_v11 = vand.u32 2147483648, %v201_v8  ;;  %vm206_vm2 = vcmp.eq.f32.partialorder %v201_v8, 0.0 }
 0x163   : > { %v364_v9 = vpop.eup %363 }
 0x164   : > { %v203_v10 = vmul.f32 %v364_v9, %v201_v8 }
 0x166   : > { %v205_v12 = vsel %vm204_vm1, %v201_v8, %v203_v10 }
 0x167   : > { %v208_v13 = vsel %vm206_vm2, %v207_v11, %v205_v12 }
 0x168   : > { %v209_v14 = vadd.f32 1e-06, %v208_v13 }
 0x16a   : > { %365 = vrcp.f32 %v209_v14 }
 0x177   : > { %v366_v16 = vpop.eup %365 }
 0x178   : > { %v213_v17 = vmul.f32 %v366_v16, %v212_v15 }
 0x17a   : > { %v215_v19 = vmul.f32 %v213_v17, %v194_v3  ;;  %v218_v21 = vmul.f32 %v213_v17, %v188_v0 }
 0x17c   : > { %v217_v20 = vsub.f32 %v216_v18, %v215_v19 }
 0x17e   : > { %v219_v22 = vadd.f32 %v218_v21, %v217_v20 }
 0x180   : > { %220 = vst.msk [vmem:[%s187_s8] sm:$0xff] %vm189_vm0, %v219_v22 }
 0x181   : > { %408 = shalt.err (!%p405_p10)
}
 0x182   : > { %s409_s21 = scalar_lea.hbm %s233_s12, 128  ;;  %s413_s28 = scalar_lea.hbm %s640_s3, 256 }
 0x183   : > { %p410_p2 = scmp.ne.s32.totalorder %s233_s12, %s409_s21  ;;  %p414_p7 = scmp.lt.s32.totalorder %s233_s12, %s640_s3 }
 0x184   : > { %p415_p0 = scmp.lt.s32.totalorder %s413_s28, %s409_s21 }
 0x185   : > { %p411_p4 = pnand %p410_p2, %p651_p12 }
 0x186   : > { %p416_p6 = por %p415_p0, %p414_p7 }
 0x187   : > { %p412_p9 = pneg %p411_p4 }
 0x189   : > { %p417_p11 = pnand %p416_p6, %p412_p9 }
 0x18b   : > { %420 = shalt.err (!%p417_p11)
}
 0x18c   : > { %319 = dma.vmem_to_hbm [thread:$0]  (%p651_p12), %s236_s9, 128, %s233_s12, %s222_s13  }
 0x18d PF: > { %s247_s4 = sand.u32 1, %s447_s16   ;;  %p652_p13 = scmp.ne.s32.totalorder %s646_s27, 0 }
 0x18e   : > { %p653_p1 = scmp.ge.s32.totalorder %s459_s19, 2  ;;  %s248_s5 = scalar_lea.sflag [#allocation6], %s247_s4 }
 0x190   : > { %p326_p3 = pnand %p653_p1, %p652_p13 }
 0x192   : > { %p327_p5 = pneg %p326_p3 }
 0x194   : > { %442 = dma.done.wait (%p327_p5), %s248_s5, 128  }
 0x195   : > { %444 = vsyncadd (%p327_p5), %s248_s5, 4294967168  ;;  %p18_p8 = scmp.ge.s32.totalorder %s514_s20, 4   ;;  %s654_s16 = smov %s451_s17 }
 0x196   : > { %s655_s17 = smov %s455_s18  ;;  %s656_s18 = smov %s526_s23 }
 0x197   : > { %s657_s19 = smov %s514_s20  ;;  %20 = sbr.rel (!%p18_p8) target bundleno = 8 (0x8), region = 77 }
 0x19c   :  { %253 = vsyncpa [#allocation5], 1 }
 0x19d   :  { %255 = vsyncpa [#allocation5 + $0x1], 1 }
 0x19e   :  { %256 = vsyncpa [#allocation6], 1 }
 0x19f   :  { %258 = vsyncpa [#allocation6 + $0x1], 1 }

</bundles_post_ra>
